<compile_context>
chip_gen: v7x
topology: tpu7x:2x2x1
jax: 0.10.0
libtpu: 0.0.40
codegen_flags: <defaults>
</compile_context>

<pallas_src>
import jax
import jax.numpy as jnp
from jax import lax
from jax.experimental import pallas as pl
from jax.experimental.pallas import tpu as pltpu


# ----------------------------------------------------------------------------
# Pallas kernel: one grid step per markable; document stays VMEM-resident.
# ----------------------------------------------------------------------------
def _attn_markable_kernel(spans_ref, emb_ref, w_ref, out_ref):
    # spans_ref: SMEM (M, 2) int32 scalar-prefetch  -> [start_token, end_token)
    # emb_ref:   VMEM (T, Dp) f32  (same block every grid step -> resident)
    # w_ref:     VMEM (1, Dp) f32  (Linear weight row, zero-padded)
    # out_ref:   VMEM (1, 1, Dp) f32  (this markable's output row)
    m = pl.program_id(0)
    start = spans_ref[m, 0]
    end = spans_ref[m, 1]

    T, Dp = emb_ref.shape
    emb = emb_ref[...]                                           # (T, Dp)
    w_row = w_ref[...]                                           # (1, Dp)

    # Lane-dense scores: contract over D on the MXU -> (1, T).
    scores = lax.dot_general(
        w_row, emb,
        dimension_numbers=(((1,), (1,)), ((), ())),
        preferred_element_type=jnp.float32)                      # (1, T)

    # Restrict to the markable span [start, end) with a lane-axis iota mask.
    pos = lax.broadcasted_iota(jnp.int32, (1, T), 1)             # (1, T)
    in_span = (pos >= start) & (pos < end)
    masked = jnp.where(in_span, scores, jnp.float32(-1e30))      # (1, T)

    # Numerically-stable softmax over the lane axis (cheap lane reductions).
    mval = jnp.max(masked, axis=-1, keepdims=True)               # (1, 1)
    e = jnp.where(in_span, jnp.exp(masked - mval),
                  jnp.float32(0.0))                              # (1, T)
    denom = jnp.sum(e, axis=-1, keepdims=True)                   # (1, 1)
    # Guard empty spans (start == end or span outside [0, T)): output zeros
    # instead of NaN.
    attn = e / jnp.maximum(denom, jnp.float32(1e-30))            # (1, T)

    # Attention-weighted sum as an MXU contraction: (1,T)@(T,Dp) -> (1,Dp).
    out = jnp.dot(attn, emb, preferred_element_type=jnp.float32)
    out_ref[...] = out.reshape(out_ref.shape)


# ----------------------------------------------------------------------------
# Wrapper: one launch for all markables of a document.
# ----------------------------------------------------------------------------
@jax.jit
def attention_markable_embeddings(embeddings, w, spans):
    """Batched Pallas forward.

    embeddings: (T, D) float32 document embeddings
    w:          (D, 1) float32 Linear weight (bias omitted: cancels in softmax)
    spans:      (M, 2) int32   [start_token, end_token) per markable
    Returns:    (M, D) float32 attended embedding per markable.
    """
    T, D = embeddings.shape
    M = spans.shape[0]

    # Pad the feature axis to a multiple of 128 so scores/output are
    # lane-dense and stores are unmasked. Zero-padded weight lanes => the
    # padded output lanes are exactly zero and are sliced off below.
    Dp = max(128, ((D + 127) // 128) * 128)
    emb_p = jnp.pad(embeddings, ((0, 0), (0, Dp - D)))
    w_row = jnp.pad(w.reshape(1, D), ((0, 0), (0, Dp - D)))

    out = pl.pallas_call(
        _attn_markable_kernel,
        out_shape=jax.ShapeDtypeStruct((M, 1, Dp), jnp.float32),
        grid_spec=pltpu.PrefetchScalarGridSpec(
            num_scalar_prefetch=1,
            grid=(M,),
            in_specs=[
                # Same block index every step -> DMA'd once, VMEM-resident.
                pl.BlockSpec((T, Dp), lambda m, spans: (0, 0)),
                pl.BlockSpec((1, Dp), lambda m, spans: (0, 0)),
            ],
            out_specs=pl.BlockSpec((1, 1, Dp), lambda m, spans: (m, 0, 0)),
        ),
        compiler_params=pltpu.CompilerParams(
            dimension_semantics=("parallel",)),   # v7x: shard markables on 2 TCs
    )(spans, emb_p, w_row)

    return out[:, 0, :D]                                          # (M, D)


# ----------------------------------------------------------------------------
# Pure-JAX reference (same math as the PyTorch module, *with* bias, to show
# the bias cancels exactly under softmax).
# ----------------------------------------------------------------------------
def _ref_forward(embeddings, w, b, start_token, end_token):
    span = embeddings[start_token:end_token]                      # (L, D)
    scores = span @ w + b                                         # (L, 1)
    attn = jax.nn.softmax(scores.reshape(1, -1), axis=1)          # (1, L)
    return jnp.sum(attn.reshape(-1, 1) * span, axis=0)            # (D,)


# ----------------------------------------------------------------------------
if __name__ == "__main__":
    # Small shapes consistent with the module: a 12-token document of
    # 32-dim word embeddings, three markables with different spans.
    embedding_dim = 32
    doc_len = 12

    key = jax.random.PRNGKey(0)
    k_emb, k_w, k_b = jax.random.split(key, 3)

    embeddings = jax.random.normal(k_emb, (doc_len, embedding_dim),
                                   dtype=jnp.float32)
    # nn.Linear(embedding_dim, 1) parameters (weight stored transposed for
    # x @ w; bias only used by the reference — it cancels in softmax).
    stdv = 1.0 / jnp.sqrt(jnp.float32(embedding_dim))
    w = jax.random.uniform(k_w, (embedding_dim, 1),
                           minval=-stdv, maxval=stdv, dtype=jnp.float32)
    b = jax.random.uniform(k_b, (1, 1),
                           minval=-stdv, maxval=stdv, dtype=jnp.float32)

    # All markables of the document handled by ONE pallas_call.
    markables = [(3, 9), (0, 4), (7, 12)]
    spans = jnp.asarray(markables, dtype=jnp.int32)               # (M, 2)

    out = attention_markable_embeddings(embeddings, w, spans)
    out = jax.block_until_ready(out)
    assert out.shape == (len(markables), embedding_dim)

    ok = True
    for i, (start_token, end_token) in enumerate(markables):
        ref = jax.block_until_ready(
            _ref_forward(embeddings, w, b, start_token, end_token))
        err = jnp.max(jnp.abs(out[i] - ref))
        if err >= 1e-5:
            ok = False
            print(f"mismatch for span ({start_token},{end_token}): {err}")

    # TODO(synk): to_cuda()/use_cuda is a device-placement flag with no TPU
    # kernel equivalent; it is a no-op here.
    assert ok, "Pallas output mismatch vs reference"
    print("KERNEL_OK")
</pallas_src>

<mosaic_0001>
module attributes {stable_mosaic.version = 11 : i64} {
  func.func @_attn_markable_kernel(%arg0: i32, %arg1: memref<3x2xi32, #tpu.memory_space<smem>>, %arg2: memref<12x128xf32, #tpu.memory_space<vmem>>, %arg3: memref<1x128xf32, #tpu.memory_space<vmem>>, %arg4: memref<1x1x128xf32, #tpu.memory_space<vmem>>) attributes {dimension_semantics = [#tpu.dimension_semantics<parallel>], iteration_bounds = array<i64: 3>, scalar_prefetch = 1 : i64, scratch_operands = 0 : i64, tpu.core_type = #tpu.core_type<tc>, window_params = [{pipeline_mode = #tpu.pipeline_mode<synchronous>, transform_indices = @transform_0, window_bounds = array<i64: 12, 128>}, {pipeline_mode = #tpu.pipeline_mode<synchronous>, transform_indices = @transform_1, window_bounds = array<i64: 1, 128>}, {transform_indices = @transform_2, window_bounds = array<i64: 1, 1, 128>}]} {
    %0 = arith.index_cast %arg0 : i32 to index
    %c0 = arith.constant 0 : index
    %1 = memref.load %arg1[%0, %c0] : memref<3x2xi32, #tpu.memory_space<smem>>
    %2 = arith.index_cast %arg0 : i32 to index
    %c1 = arith.constant 1 : index
    %3 = memref.load %arg1[%2, %c1] : memref<3x2xi32, #tpu.memory_space<smem>>
    %c0_0 = arith.constant 0 : index
    %c0_1 = arith.constant 0 : index
    %4 = vector.load %arg2[%c0_0, %c0_1] : memref<12x128xf32, #tpu.memory_space<vmem>>, vector<12x128xf32>
    %c0_2 = arith.constant 0 : index
    %c0_3 = arith.constant 0 : index
    %5 = vector.load %arg3[%c0_2, %c0_3] : memref<1x128xf32, #tpu.memory_space<vmem>>, vector<1x128xf32>
    %cst = arith.constant dense<0.000000e+00> : vector<1x12xf32>
    %6 = tpu.matmul %5, %4, %cst {dimension_numbers = #tpu.dot_dimension_numbers<[1], [1], [0], [0], [0, 0, 1, 0], [], []>} : vector<1x128xf32>, vector<12x128xf32>, vector<1x12xf32> -> vector<1x12xf32>
    %7 = tpu.iota {dimensions = array<i32: 1>} : vector<1x12xi32>
    %8 = vector.broadcast %1 : i32 to vector<1x12xi32>
    %9 = arith.cmpi sge, %7, %8 : vector<1x12xi32>
    %10 = vector.broadcast %3 : i32 to vector<1x12xi32>
    %11 = arith.cmpi slt, %7, %10 : vector<1x12xi32>
    %12 = arith.andi %9, %11 : vector<1x12xi1>
    %cst_4 = arith.constant -1.000000e+30 : f32
    %13 = vector.broadcast %cst_4 : f32 to vector<1x12xf32>
    %14 = arith.select %12, %6, %13 : vector<1x12xi1>, vector<1x12xf32>
    %cst_5 = arith.constant dense<0xFF800000> : vector<1xf32>
    %15 = vector.multi_reduction <maximumf>, %14, %cst_5 [1] : vector<1x12xf32> to vector<1xf32>
    %16 = vector.shape_cast %15 : vector<1xf32> to vector<1x1xf32>
    %17 = vector.broadcast %16 : vector<1x1xf32> to vector<1x12xf32>
    %18 = arith.subf %14, %17 : vector<1x12xf32>
    %19 = math.exp %18 : vector<1x12xf32>
    %cst_6 = arith.constant 0.000000e+00 : f32
    %20 = vector.broadcast %cst_6 : f32 to vector<1x12xf32>
    %21 = arith.select %12, %19, %20 : vector<1x12xi1>, vector<1x12xf32>
    %cst_7 = arith.constant dense<0.000000e+00> : vector<1xf32>
    %22 = vector.multi_reduction <add>, %21, %cst_7 [1] : vector<1x12xf32> to vector<1xf32>
    %23 = vector.shape_cast %22 : vector<1xf32> to vector<1x1xf32>
    %cst_8 = arith.constant 1.000000e-30 : f32
    %24 = vector.broadcast %cst_8 : f32 to vector<1x1xf32>
    %25 = arith.maximumf %23, %24 : vector<1x1xf32>
    %26 = vector.broadcast %25 : vector<1x1xf32> to vector<1x12xf32>
    %27 = arith.divf %21, %26 : vector<1x12xf32>
    %cst_9 = arith.constant dense<0.000000e+00> : vector<1x128xf32>
    %28 = tpu.matmul %27, %4, %cst_9 {dimension_numbers = #tpu.dot_dimension_numbers<[1], [0], [0], [1], [0, 0, 1, 1], [], []>} : vector<1x12xf32>, vector<12x128xf32>, vector<1x128xf32> -> vector<1x128xf32>
    %29 = vector.shape_cast %28 : vector<1x128xf32> to vector<1x1x128xf32>
    %c0_10 = arith.constant 0 : index
    %c0_11 = arith.constant 0 : index
    %c0_12 = arith.constant 0 : index
    %30 = vector.load %arg4[%c0_10, %c0_11, %c0_12] : memref<1x1x128xf32, #tpu.memory_space<vmem>>, vector<1x1x128xf32>
    tpu.vector_store %arg4[%c0_10, %c0_11, %c0_12], %29 {strides = array<i32>} : memref<1x1x128xf32, #tpu.memory_space<vmem>>, vector<1x1x128xf32>,
    return
  }
  func.func @transform_0(%arg0: i32, %arg1: memref<3x2xi32, #tpu.memory_space<smem>>) -> (i32, i32) {
    %c0_i32 = arith.constant 0 : i32
    %c0_i32_0 = arith.constant 0 : i32
    %c0_i32_1 = arith.constant 0 : i32
    return %c0_i32, %c0_i32_0 : i32, i32
  }
  func.func @transform_1(%arg0: i32, %arg1: memref<3x2xi32, #tpu.memory_space<smem>>) -> (i32, i32) {
    %c0_i32 = arith.constant 0 : i32
    %c0_i32_0 = arith.constant 0 : i32
    %c0_i32_1 = arith.constant 0 : i32
    return %c0_i32, %c0_i32_0 : i32, i32
  }
  func.func @transform_2(%arg0: i32, %arg1: memref<3x2xi32, #tpu.memory_space<smem>>) -> (i32, i32, i32) {
    %c0_i32 = arith.constant 0 : i32
    %c0_i32_0 = arith.constant 0 : i32
    %c0_i32_1 = arith.constant 0 : i32
    return %arg0, %c0_i32, %c0_i32_0 : i32, i32, i32
  }
}

</mosaic_0001>

<bundles_post_ra>
// kernel: attention_markable_embeddings.1
= control target key start
LH: loop header
LB: loop body
LE: loop exit
PB: predicated region body
PF: predicated region fallthrough
CT: control target
= control target key end

     0   :  { %s471_s0 = inlined_call_operand.vmem [shape: s32[3,2], index: 0, kind: input, shape index: {}]   ;;  %s472_s1 = inlined_call_operand.vmem [shape: f32[12,128], index: 1, kind: input, shape index: {}]   ;;  %s473_s2 = inlined_call_operand.vmem [shape: f32[1,128], index: 2, kind: input, shape index: {}]   ;;  %s474_s3 = inlined_call_operand.vmem [shape: f32[3,1,128], index: 3, kind: output, shape index: {}]  }
   0x1   :  { %s8_s14 = sshll.u32 %s471_s0, 4  ;;  %s9_s14 = int_to_ptr.vmem [resolvable:$true] %s8_s14 }
   0x2   :  { %s393_s15 = scalar_lea.vmem %s9_s14, 64  ;;  %p398_p1 = scmp.lt.s32.totalorder %s9_s14, %s9_s14 }
   0x3   :  { %p394_p0 = scmp.ne.s32.totalorder %s9_s14, %s393_s15  ;;  %p399_p2 = scmp.lt.s32.totalorder %s393_s15, %s393_s15 }
   0x5   :  { %p400_p3 = por %p399_p2, %p398_p1 }
   0x7   :  { %p401_p4 = pnand %p400_p3, %p394_p0 }
   0x9   :  { %404 = shalt.err (!%p401_p4)  }
   0xa   :  { %s415_s16 = smov [#allocation3]  }
   0xb   :  { %11 = dma.vmem_to_smem %s9_s14, 64, %s415_s16, [#allocation2] }
   0xc   :  { %409 = dma.done.wait [#allocation2], 64 }
   0xd   :  { %410 = vsyncadd [#allocation2], 4294967232 }
   0xe   :  { %13 = sfence }
   0xf   :  { %s443_s17 = smov 0  }
  0x10 LB: > { %s449_s0 = sadd.s32 4294967295, %s413_s17   ;;  %p343_p5 = scmp.ge.s32.totalorder %s413_s17, 1  ;;  %s413_s17 = sphi %s443_s17, %s19_s17  }
  0x11   : > { %p109_p6 = scmp.lt.s32.totalorder %s413_s17, 4 }
  0x13   : > { %p110_p7 = pnand %p343_p5, %p109_p6 }
  0x14   : > { %v131_v0 = vld [vmem:[%s472_s1] sm:$0xff] (!%p110_p7)  ;;  %v132_v1 = vld [vmem:[%s472_s1 + $0x8] sm:$0xf] (!%p110_p7)  ;;  %v416_v2 = vmov (!%p110_p7), 0.0|0.0   ;;  %vm417_vm0 = vmmov (!%p110_p7), 0   ;;  %v418_v4 = vmov (!%p110_p7), 0.0   ;;  %v204_v6 = vlaneseq (!%p110_p7) }
  0x15   : > { %113 = sbr.rel (%p110_p7) target bundleno = 773 (0x305), region = 28  ;;  %369 = vmatprep.subr.bf16.mxu0 (!%p110_p7), %v416_v2  ;;  %v370_v3 = vpack.c.bf16 (!%p110_p7), %v132_v1, %v131_v0  ;;  %359 = vmatprep.mubr.msk.f32.mxu0 (!%p110_p7), %vm417_vm0, %v418_v4  ;;  %v133_v5 = vld [vmem:[%s473_s2] sm:$0x1] (!%p110_p7)  ;;  %s344_s24 = sshll.u32 (!%p110_p7), %s449_s0, 7  ;;  %vm212_vm4 = vcmask (!%p110_p7), 90112   ;;  %vm230_vm5 = vcmask (!%p110_p7), 1043456  }
  0x16   : > { %372 = vmatprep.subr.bf16.mxu1 (!%p110_p7), %v416_v2  ;;  %366 = vmatprep.mubr.msk.f32.mxu1 (!%p110_p7), %vm417_vm0, %v418_v4  ;;  %s129_s25 = sadd.s32 (!%p110_p7), 1, %s344_s24  ;;  %s128_s26 = sld [smem:[#allocation3 + %s344_s24]] (!%p110_p7)  ;;  %v205_v7 = vand.u32 (!%p110_p7), 127, %v204_v6  ;;  %vm419_vm6 = vmmov (!%p110_p7), 1   ;;  %vm226_vm8 = vcmask (!%p110_p7), 97280  }
  0x17   : > { %371 = vmatpush3.bf16.xpose.msra.mxu0 (!%p110_p7), %v370_v3  ;;  %s130_s27 = sld [smem:[#allocation3 + %s129_s25]] (!%p110_p7)  ;;  %vm374_vm7 = vmpackc.low (!%p110_p7), %vm230_vm5, %vm419_vm6  ;;  %p124_p8 = scmp.lt.s32.totalorder (!%p110_p7), %s449_s0, 2 }
  0x18   : > { %375 = vmatpush3.bf16.msk.msra.mxu1 (!%p110_p7), %vm374_vm7, %v370_v3 }
  0x1c   : > { %v206_v8 = vstv %s128_s26  ;;  %s476_s0 = smov (!%p124_p8, %s449_s0), 2 }
  0x1d   : > { %v208_v9 = vstv %s130_s27  ;;  %vm207_vm1 = vcmp.ge.s32.totalorder %v205_v7, %v206_v8  ;;  %s126_s30 = scalar_lea.vmem %s474_s3, %s476_s0 }
  0x1e   : > { %360 = vmatmul.mubr.f32.vlgmr.msra.gmra.mrb[0].mxu0 %v133_v5  ;;  %vm209_vm2 = vcmp.lt.s32.totalorder %v205_v7, %v208_v9 }
  0x1f   : > { %vm210_vm3 = vmand %vm207_vm1, %vm209_vm2 }
  0xf1   : > { %v200_v10 = vpop.f32.mrb[0].mxu0 }
  0xf2   : > { %v211_v11 = vsel %vm210_vm3, %v200_v10, -1e+30  ;;  %v361_v12 = vpop.f32.mrb[1].mxu0 }
  0xf3   : > { %v213_v13 = vsel %vm212_vm4, %v211_v11, -inf }
  0xf4   : > { %214 = vmax.xlane.f32.xlu0 %v213_v13 }
 0x181   : > { %v215_v14 = vpop.xlane.xlu0 %214 }
 0x182   : > { %v216_v15 = vsub.f32 %v211_v11, %v215_v14 }
 0x184   : > { %v217_v16 = vmul.f32 1.442695, %v216_v15 }
 0x186   : > { %389 = vpow2.f32 %v217_v16 }
 0x190   : > { %v390_v17 = vpop.eup %389 }
 0x191   : > { %v219_v18 = vsel %vm210_vm3, %v390_v17, 0.0 }
 0x192   : > { %v220_v19 = vsel %vm212_vm4, %v219_v18, 0.0 }
 0x193   : > { %221 = vadd.xlane.f32.xlu0 %v220_v19 }
 0x220   : > { %v222_v20 = vpop.xlane.xlu0 %221 }
 0x221   : > { %v223_v21 = vmax.f32 %v222_v20, 1e-30 }
 0x223   : > { %391 = vrcp.f32 %v223_v21 }
 0x22d   : > { %v392_v22 = vpop.eup %391 }
 0x22e   : > { %v225_v23 = vmul.f32 %v392_v22, %v219_v18 }
 0x230   : > { %367 = vmatmul.mubr.msk.f32.vlgmr.msra.gmra.mrb[0].mxu1 %vm226_vm8, %v225_v23 }
 0x303   : > { %v300_v24 = vpop.f32.mrb[0].mxu1 }
 0x304   : > { %304 = vst [vmem:[%s126_s30] sm:$0x1] %v300_v24  ;;  %v368_v25 = vpop.f32.mrb[1].mxu1 }
 0x305 PF: > { %s19_s17 = sadd.s32 1, %s413_s17  }
 0x306   : > { %p16_p9 = scmp.ge.s32.totalorder %s19_s17, 5  }
 0x308   :  { %18 = sbr.rel (!%p16_p9) target bundleno = 16 (0x10), region = 55 }

</bundles_post_ra>
